<compile_context>
chip_gen: v7x
topology: tpu7x:2x2x1
jax: 0.10.0
libtpu: 0.0.40
codegen_flags: <defaults>
</compile_context>

<pallas_src>
import functools
import math

import jax
import jax.numpy as jnp
from jax.experimental import pallas as pl
from jax.experimental.pallas import tpu as pltpu

_LANE = 128


def _round_up(v, m):
    return (v + m - 1) // m * m


def _mxu_align(dim):
    # 128 alignment is always valid (lanes / v5e 128-wide MXU); use 256 for
    # large dims so the 2x256x256 MXUs on v6e/v7x stay fully utilised.
    return _round_up(dim, 256 if dim >= 512 else _LANE)


@functools.lru_cache(maxsize=1)
def _vmem_cap_bytes():
    # Generation-aware VMEM cap with ~25% headroom for compiler scratch, DMA
    # descriptors and semaphores: v5e/v6e (128 MiB) -> ~96 MiB, v7x (64 MiB)
    # -> ~48 MiB. Fall back to the smallest (v7x) if the query is unavailable.
    phys = 64 * 1024 * 1024
    try:
        phys = int(pltpu.get_tpu_info().vmem_capacity_bytes)
    except Exception:
        pass
    return (phys * 3) // 4


def _mlp_kernel(x_ref, w1_ref, b1_ref, w2_ref, b2_ref, o_ref):
    # Cast the streamed x tile to the compute dtype *inside* the kernel so the
    # wrapper never pays an extra HBM round-trip just to cast x.
    x = x_ref[...].astype(w1_ref.dtype)
    # layer 1: (TM, Fp) @ (Fp, Hp), f32 accumulation on the MXU.
    h = jnp.dot(x, w1_ref[...], preferred_element_type=jnp.float32)
    # bias-add + ReLU in f32 (biases are kept f32 even on the bf16 path).
    h = jnp.maximum(h + b1_ref[...], 0.0)
    # layer 2: cast post-ReLU activations to W2's dtype (intentional downcast
    # only on the opt-in bf16 inference path), f32 accumulation.
    y = jnp.dot(h.astype(w2_ref.dtype), w2_ref[...],
                preferred_element_type=jnp.float32)
    o_ref[...] = (y + b2_ref[...]).astype(o_ref.dtype)


def prepare_perceptron_params(w1, b1, w2, b2, *, x_dtype=jnp.float32,
                              use_bf16_matmul=False):
    """One-time pad/cast of the weights (hoisted out of the per-call forward).

    w1: (F, H), w2: (H, C) -- torch.nn.Linear weights already transposed to
    (in_features, out_features). Biases: (H,), (C,).
    """
    f, h = w1.shape
    h2, c = w2.shape
    assert h2 == h, "w1/w2 hidden dims disagree"
    if use_bf16_matmul:
        compute_dtype = jnp.bfloat16
    else:
        # Never silently downcast: compute in the widest of x / weight dtypes.
        compute_dtype = jnp.promote_types(jnp.dtype(x_dtype),
                                          jnp.result_type(w1.dtype, w2.dtype))
    fp, hp, cp = _mxu_align(f), _mxu_align(h), _mxu_align(c)
    # Zero padding: padded x columns hit zero rows of W1, padded hidden cols
    # give relu(0 + 0) = 0 into zero rows of W2 -> results exact after slicing.
    w1_p = jnp.zeros((fp, hp), compute_dtype).at[:f, :h].set(w1.astype(compute_dtype))
    w2_p = jnp.zeros((hp, cp), compute_dtype).at[:h, :c].set(w2.astype(compute_dtype))
    b1_p = jnp.zeros((1, hp), jnp.float32).at[0, :h].set(b1.astype(jnp.float32))
    b2_p = jnp.zeros((1, cp), jnp.float32).at[0, :c].set(b2.astype(jnp.float32))
    return w1_p, b1_p, w2_p, b2_p, c


@functools.partial(jax.jit, static_argnames=("n_classes", "block_m"))
def _forward_padded(x, w1_p, b1_p, w2_p, b2_p, *, n_classes, block_m=512):
    n, f = x.shape
    fp, hp = w1_p.shape
    cp = w2_p.shape[1]
    assert f <= fp and n_classes <= cp
    out_dtype = x.dtype

    x_bytes = jnp.dtype(x.dtype).itemsize
    w_bytes = jnp.dtype(w1_p.dtype).itemsize
    o_bytes = jnp.dtype(out_dtype).itemsize
    # bf16 native vreg tile is (16, 128); f32 is (8, 128).
    sub = 16 if (x_bytes == 2 or w_bytes == 2) else 8

    # --- batch tiling -------------------------------------------------------
    # (a) number of tiles chosen to minimize batch padding for awkward N,
    # (b) at least 2 tiles when N allows so both v7x TensorCores get work
    #     (the grid axis is "parallel"; no-op on v5e/v6e),
    # (c) shrink tm -- not the VMEM limit -- if the tile budget exceeds the cap.
    num_tiles = max(1, -(-n // block_m))
    if n >= 2 * sub:
        num_tiles = max(num_tiles, 2)
    tm = _round_up(-(-n // num_tiles), sub)

    cap = _vmem_cap_bytes()

    def vmem_est(tm_):
        stream = 2 * tm_ * fp * x_bytes + 2 * tm_ * cp * o_bytes     # double-buffered
        resident = (fp * hp + hp * cp) * w_bytes + (hp + cp) * 4     # Buffered(1)
        interm = tm_ * hp * 4 + tm_ * (hp + fp) * w_bytes            # f32 h + casts
        return int(1.5 * (stream + interm)) + resident

    while tm > sub and vmem_est(tm) > cap:
        tm = max(sub, _round_up(tm // 2, sub))

    n_pad = _round_up(n, tm)
    grid = (n_pad // tm,)

    # Skip the wrapper-side copy of x when padding is a no-op. (Padded feature
    # columns multiply zero rows of W1_p so their contents are irrelevant;
    # padded batch rows are sliced off below.)
    if n_pad == n and fp == f:
        x_p = x
    else:
        x_p = jnp.zeros((n_pad, fp), x.dtype).at[:n, :f].set(x)

    # Constant-index operands: single-buffer them (double-buffering only
    # burns VMEM when the block never changes).
    resident = functools.partial(pl.BlockSpec, pipeline_mode=pl.Buffered(1))

    out_p = pl.pallas_call(
        _mlp_kernel,
        out_shape=jax.ShapeDtypeStruct((n_pad, cp), out_dtype),
        grid=grid,
        in_specs=[
            pl.BlockSpec((tm, fp), lambda i: (i, 0)),   # x: streamed per tile
            resident((fp, hp), lambda i: (0, 0)),       # W1: resident
            resident((1, hp), lambda i: (0, 0)),        # b1: resident
            resident((hp, cp), lambda i: (0, 0)),       # W2: resident
            resident((1, cp), lambda i: (0, 0)),        # b2: resident
        ],
        out_specs=pl.BlockSpec((tm, cp), lambda i: (i, 0)),
        compiler_params=pltpu.CompilerParams(
            dimension_semantics=("parallel",),          # batch tiles independent
            vmem_limit_bytes=int(cap)),
    )(x_p, w1_p, b1_p, w2_p, b2_p)

    return out_p[:n, :n_classes]


def make_perceptron(w1, b1, w2, b2, *, use_bf16_matmul=False, block_m=512,
                    x_dtype=jnp.float32):
    """Returns forward(x) = relu(x @ w1 + b1) @ w2 + b2 with weights
    padded/cast exactly once (not per call)."""
    w1_p, b1_p, w2_p, b2_p, c = prepare_perceptron_params(
        w1, b1, w2, b2, x_dtype=x_dtype, use_bf16_matmul=use_bf16_matmul)

    def forward(x):
        return _forward_padded(x, w1_p, b1_p, w2_p, b2_p,
                               n_classes=c, block_m=block_m)

    return forward


def init_linear_params(key, in_features, out_features, dtype=jnp.float32):
    """Match torch.nn.Linear default init: U(-1/sqrt(fan_in), 1/sqrt(fan_in)).
    Returns weight already transposed to (in_features, out_features)."""
    kw, kb = jax.random.split(key)
    bound = 1.0 / math.sqrt(in_features)
    w = jax.random.uniform(kw, (in_features, out_features),
                           minval=-bound, maxval=bound, dtype=dtype)
    b = jax.random.uniform(kb, (out_features,),
                           minval=-bound, maxval=bound, dtype=dtype)
    return w, b


if __name__ == "__main__":
    # Small, module-consistent shapes.
    batch, n_features, n_hidden, n_classes = 8, 32, 32, 16

    key = jax.random.PRNGKey(0)
    kx, k1, k2 = jax.random.split(key, 3)

    x = jax.random.normal(kx, (batch, n_features), dtype=jnp.float32)
    w1, b1 = init_linear_params(k1, n_features, n_hidden)
    w2, b2 = init_linear_params(k2, n_hidden, n_classes)

    # Pure-JAX reference (torch semantics: f32 Linear -> ReLU -> Linear).
    ref = jnp.maximum(x @ w1 + b1, 0.0) @ w2 + b2

    # f32 path (default, torch-exact). Weights are prepared once here.
    fwd = make_perceptron(w1, b1, w2, b2)
    out = jax.block_until_ready(fwd(x))
    assert out.shape == (batch, n_classes)
    assert jnp.allclose(out, ref, atol=1e-5, rtol=1e-5)

    # Opt-in bf16 MXU fast path (f32 accumulation): loose tolerance vs f32 ref.
    fwd_bf16 = make_perceptron(w1, b1, w2, b2, use_bf16_matmul=True)
    out_bf16 = jax.block_until_ready(fwd_bf16(x))
    assert jnp.allclose(out_bf16, ref, atol=5e-2, rtol=5e-2)

    # Larger, awkward batch: exercises the minimal-padding multi-tile
    # "parallel" grid path (300 rows -> 2 tiles of 152 rows).
    xb = jax.random.normal(jax.random.fold_in(kx, 1), (300, n_features),
                           dtype=jnp.float32)
    refb = jnp.maximum(xb @ w1 + b1, 0.0) @ w2 + b2
    outb = jax.block_until_ready(fwd(xb))
    assert outb.shape == (300, n_classes)
    assert jnp.allclose(outb, refb, atol=1e-5, rtol=1e-5)

    print("KERNEL_OK")
</pallas_src>

<mosaic_0001>
module attributes {stable_mosaic.version = 11 : i64} {
  func.func @_mlp_kernel(%arg0: i32, %arg1: memref<8x128xf32, #tpu.memory_space<vmem>>, %arg2: memref<128x128xf32, #tpu.memory_space<vmem>>, %arg3: memref<1x128xf32, #tpu.memory_space<vmem>>, %arg4: memref<128x128xf32, #tpu.memory_space<vmem>>, %arg5: memref<1x128xf32, #tpu.memory_space<vmem>>, %arg6: memref<8x128xf32, #tpu.memory_space<vmem>>) attributes {dimension_semantics = [#tpu.dimension_semantics<parallel>], iteration_bounds = array<i64: 1>, scalar_prefetch = 0 : i64, scratch_operands = 0 : i64, tpu.core_type = #tpu.core_type<tc>, window_params = [{transform_indices = @transform_0, window_bounds = array<i64: 8, 128>}, {pipeline_mode = #tpu.pipeline_mode<synchronous>, transform_indices = @transform_1, window_bounds = array<i64: 128, 128>}, {pipeline_mode = #tpu.pipeline_mode<synchronous>, transform_indices = @transform_2, window_bounds = array<i64: 1, 128>}, {pipeline_mode = #tpu.pipeline_mode<synchronous>, transform_indices = @transform_3, window_bounds = array<i64: 128, 128>}, {pipeline_mode = #tpu.pipeline_mode<synchronous>, transform_indices = @transform_4, window_bounds = array<i64: 1, 128>}, {transform_indices = @transform_5, window_bounds = array<i64: 8, 128>}]} {
    %c0 = arith.constant 0 : index
    %c0_0 = arith.constant 0 : index
    %0 = vector.load %arg1[%c0, %c0_0] : memref<8x128xf32, #tpu.memory_space<vmem>>, vector<8x128xf32>
    %c0_1 = arith.constant 0 : index
    %c0_2 = arith.constant 0 : index
    %1 = vector.load %arg2[%c0_1, %c0_2] : memref<128x128xf32, #tpu.memory_space<vmem>>, vector<128x128xf32>
    %cst = arith.constant dense<0.000000e+00> : vector<8x128xf32>
    %2 = tpu.matmul %0, %1, %cst {dimension_numbers = #tpu.dot_dimension_numbers<[1], [0], [0], [1], [0, 0, 1, 1], [], []>} : vector<8x128xf32>, vector<128x128xf32>, vector<8x128xf32> -> vector<8x128xf32>
    %c0_3 = arith.constant 0 : index
    %c0_4 = arith.constant 0 : index
    %3 = vector.load %arg3[%c0_3, %c0_4] : memref<1x128xf32, #tpu.memory_space<vmem>>, vector<1x128xf32>
    %4 = vector.broadcast %3 : vector<1x128xf32> to vector<8x128xf32>
    %5 = arith.addf %2, %4 : vector<8x128xf32>
    %cst_5 = arith.constant 0.000000e+00 : f32
    %6 = vector.broadcast %cst_5 : f32 to vector<8x128xf32>
    %7 = arith.maximumf %5, %6 : vector<8x128xf32>
    %c0_6 = arith.constant 0 : index
    %c0_7 = arith.constant 0 : index
    %8 = vector.load %arg4[%c0_6, %c0_7] : memref<128x128xf32, #tpu.memory_space<vmem>>, vector<128x128xf32>
    %cst_8 = arith.constant dense<0.000000e+00> : vector<8x128xf32>
    %9 = tpu.matmul %7, %8, %cst_8 {dimension_numbers = #tpu.dot_dimension_numbers<[1], [0], [0], [1], [0, 0, 1, 1], [], []>} : vector<8x128xf32>, vector<128x128xf32>, vector<8x128xf32> -> vector<8x128xf32>
    %c0_9 = arith.constant 0 : index
    %c0_10 = arith.constant 0 : index
    %10 = vector.load %arg5[%c0_9, %c0_10] : memref<1x128xf32, #tpu.memory_space<vmem>>, vector<1x128xf32>
    %11 = vector.broadcast %10 : vector<1x128xf32> to vector<8x128xf32>
    %12 = arith.addf %9, %11 : vector<8x128xf32>
    %c0_11 = arith.constant 0 : index
    %c0_12 = arith.constant 0 : index
    %13 = vector.load %arg6[%c0_11, %c0_12] : memref<8x128xf32, #tpu.memory_space<vmem>>, vector<8x128xf32>
    tpu.vector_store %arg6[%c0_11, %c0_12], %12 {strides = array<i32>} : memref<8x128xf32, #tpu.memory_space<vmem>>, vector<8x128xf32>,
    return
  }
  func.func @transform_0(%arg0: i32) -> (i32, i32) {
    %c0_i32 = arith.constant 0 : i32
    %c0_i32_0 = arith.constant 0 : i32
    return %arg0, %c0_i32 : i32, i32
  }
  func.func @transform_1(%arg0: i32) -> (i32, i32) {
    %c0_i32 = arith.constant 0 : i32
    %c0_i32_0 = arith.constant 0 : i32
    %c0_i32_1 = arith.constant 0 : i32
    return %c0_i32, %c0_i32_0 : i32, i32
  }
  func.func @transform_2(%arg0: i32) -> (i32, i32) {
    %c0_i32 = arith.constant 0 : i32
    %c0_i32_0 = arith.constant 0 : i32
    %c0_i32_1 = arith.constant 0 : i32
    return %c0_i32, %c0_i32_0 : i32, i32
  }
  func.func @transform_3(%arg0: i32) -> (i32, i32) {
    %c0_i32 = arith.constant 0 : i32
    %c0_i32_0 = arith.constant 0 : i32
    %c0_i32_1 = arith.constant 0 : i32
    return %c0_i32, %c0_i32_0 : i32, i32
  }
  func.func @transform_4(%arg0: i32) -> (i32, i32) {
    %c0_i32 = arith.constant 0 : i32
    %c0_i32_0 = arith.constant 0 : i32
    %c0_i32_1 = arith.constant 0 : i32
    return %c0_i32, %c0_i32_0 : i32, i32
  }
  func.func @transform_5(%arg0: i32) -> (i32, i32) {
    %c0_i32 = arith.constant 0 : i32
    %c0_i32_0 = arith.constant 0 : i32
    return %arg0, %c0_i32 : i32, i32
  }
}

</mosaic_0001>

<bundles_post_ra>
// kernel: _forward_padded.1
= control target key start
LH: loop header
LB: loop body
LE: loop exit
PB: predicated region body
PF: predicated region fallthrough
CT: control target
= control target key end

     0   :  { %10 = vsyncpa [#allocation3], 0  ;;  %s587_s0 = inlined_call_operand.vmem [shape: f32[8,128], index: 0, kind: input, shape index: {}]   ;;  %s588_s1 = inlined_call_operand.hbm [shape: f32[128,128], index: 1, kind: input, shape index: {}]   ;;  %s589_s2 = inlined_call_operand.vmem [shape: f32[1,128], index: 2, kind: input, shape index: {}]   ;;  %s590_s3 = inlined_call_operand.hbm [shape: f32[128,128], index: 3, kind: input, shape index: {}]   ;;  %s591_s4 = inlined_call_operand.vmem [shape: f32[1,128], index: 4, kind: input, shape index: {}]   ;;  %s592_s5 = inlined_call_operand.hbm [shape: f32[8,128], index: 5, kind: output, shape index: {}]  }
   0x1   :  { %11 = vsyncpa [#allocation6], 0 }
   0x2   :  { %12 = vsyncpa [#allocation4], 0  ;;  %s488_s18 = smov [#allocation2]   ;;  %s416_s22 = scalar_lea.hbm %s588_s1, 2048 }
   0x3   :  { %s20_s19 = sshll.u32 %s488_s18, 4  ;;  %p417_p0 = scmp.ne.s32.totalorder %s588_s1, %s416_s22  ;;  %s21_s19 = int_to_ptr.vmem [resolvable:$true] %s20_s19 }
   0x4   :  { %p420_p1 = scmp.lt.u32.totalorder %s416_s22, %s588_s1 }
   0x6   :  { %p422_p2 = pnand %p420_p1, %p417_p0 }
   0x8   :  { %425 = shalt.err (!%p422_p2)
}
   0x9   :  { %s426_s27 = scalar_lea.vmem %s21_s19, 2048  ;;  %p431_p4 = scmp.lt.s32.totalorder %s21_s19, %s21_s19 }
   0xa   :  { %p427_p3 = scmp.ne.s32.totalorder %s21_s19, %s426_s27  ;;  %p432_p5 = scmp.lt.s32.totalorder %s426_s27, %s426_s27 }
   0xc   :  { %p433_p6 = por %p432_p5, %p431_p4 }
   0xe   :  { %p434_p7 = pnand %p433_p6, %p427_p3 }
  0x10   :  { %437 = shalt.err (!%p434_p7)
}
  0x11   :  { %s489_s28 = smov 128   ;;  %s490_s29 = smov 8  }
  0x12   :  { %26 = dma.hbm_to_vmem [thread:$0]  %s588_s1, 2048, %s21_s19, [#allocation3], %s489_s28, %s489_s28, %s490_s29  }
  0x13   :  { %s491_s7 = smov [#allocation5]   ;;  %s438_s11 = scalar_lea.hbm %s590_s3, 2048 }
  0x14   :  { %s34_s8 = sshll.u32 %s491_s7, 4  ;;  %p439_p8 = scmp.ne.s32.totalorder %s590_s3, %s438_s11  ;;  %s35_s8 = int_to_ptr.vmem [resolvable:$true] %s34_s8 }
  0x15   :  { %p442_p9 = scmp.lt.u32.totalorder %s438_s11, %s590_s3 }
  0x17   :  { %p444_p10 = pnand %p442_p9, %p439_p8 }
  0x19   :  { %447 = shalt.err (!%p444_p10)
}
  0x1a   :  { %s448_s16 = scalar_lea.vmem %s35_s8, 2048  ;;  %p453_p12 = scmp.lt.s32.totalorder %s35_s8, %s35_s8 }
  0x1b   :  { %p449_p11 = scmp.ne.s32.totalorder %s35_s8, %s448_s16  ;;  %p454_p13 = scmp.lt.s32.totalorder %s448_s16, %s448_s16 }
  0x1d   :  { %p455_p0 = por %p454_p13, %p453_p12 }
  0x1f   :  { %p456_p1 = pnand %p455_p0, %p449_p11 }
  0x21   :  { %459 = shalt.err (!%p456_p1)
}
  0x22   :  { %40 = dma.hbm_to_vmem [thread:$0]  %s590_s3, 2048, %s35_s8, [#allocation6], %s489_s28, %s489_s28, %s490_s29  }
  0x23   :  { %482 = dma.done.wait [#allocation3], 2048  }
  0x24   :  { %483 = vsyncadd [#allocation3], 4294965248 }
  0x25   :  { %484 = dma.done.wait [#allocation6], 2048  }
  0x26   :  { %485 = vsyncadd [#allocation6], 4294965248  ;;  %v492_v0 = vmov 0.0|0.0   ;;  %vm493_vm0 = vmmov 0   ;;  %v494_v1 = vmov 0.0   ;;  %v50_v2 = vld [vmem:[#allocation2] sm:$0xff] }
  0x27   :  { %360 = vmatprep.subr.bf16.mxu0 %v492_v0  ;;  %322 = vmatprep.mubr.msk.f32.mxu0 %vm493_vm0, %v494_v1  ;;  %v51_v3 = vld [vmem:[#allocation2 + $0x8] sm:$0xff]  ;;  %v52_v4 = vld [vmem:[#allocation2 + $0x10] sm:$0xff]  ;;  %v53_v6 = vld [vmem:[#allocation2 + $0x18] sm:$0xff] }
  0x28   :  { %384 = vmatprep.subr.bf16.mxu1 %v492_v0  ;;  %357 = vmatprep.mubr.msk.f32.mxu1 %vm493_vm0, %v494_v1  ;;  %v361_v5 = vpack.c.bf16 %v51_v3, %v50_v2  ;;  %v364_v7 = vpack.c.bf16 %v53_v6, %v52_v4  ;;  %v54_v8 = vld [vmem:[#allocation2 + $0x20] sm:$0xff]  ;;  %v55_v9 = vld [vmem:[#allocation2 + $0x28] sm:$0xff]  ;;  %v146_v12 = vld [vmem:[#allocation5 + $0x10] sm:$0xff] }
  0x29   :  { %v144_v10 = vld [vmem:[#allocation5] sm:$0xff]  ;;  %v145_v11 = vld [vmem:[#allocation5 + $0x8] sm:$0xff]  ;;  %v147_v13 = vld [vmem:[#allocation5 + $0x18] sm:$0xff]  ;;  %v367_v14 = vpack.c.bf16 %v55_v9, %v54_v8 }
  0x2a   :  { %362 = vmatpush3.bf16.msra.mxu0 %v361_v5  ;;  %v385_v15 = vpack.c.bf16 %v145_v11, %v144_v10  ;;  %v56_v16 = vld [vmem:[#allocation2 + $0x30] sm:$0xff]  ;;  %v57_v17 = vld [vmem:[#allocation2 + $0x38] sm:$0xff]  ;;  %v388_v18 = vpack.c.bf16 %v147_v13, %v146_v12  ;;  %v148_v19 = vld [vmem:[#allocation5 + $0x20] sm:$0xff] }
  0x2b   :  { %363 = vmatprep.subr.bf16.mxu0 %v492_v0  ;;  %v149_v20 = vld [vmem:[#allocation5 + $0x28] sm:$0xff]  ;;  %v370_v21 = vpack.c.bf16 %v57_v17, %v56_v16  ;;  %v58_v22 = vld [vmem:[#allocation2 + $0x40] sm:$0xff]  ;;  %v150_v25 = vld [vmem:[#allocation5 + $0x30] sm:$0xff] }
  0x2c   :  { %386 = vmatpush3.bf16.msra.mxu1 %v385_v15  ;;  %v59_v23 = vld [vmem:[#allocation2 + $0x48] sm:$0xff]  ;;  %v391_v24 = vpack.c.bf16 %v149_v20, %v148_v19  ;;  %v151_v26 = vld [vmem:[#allocation5 + $0x38] sm:$0xff]  ;;  %v60_v28 = vld [vmem:[#allocation2 + $0x50] sm:$0xff] }
  0x2d   :  { %387 = vmatprep.subr.bf16.mxu1 %v492_v0  ;;  %v373_v27 = vpack.c.bf16 %v59_v23, %v58_v22  ;;  %v61_v29 = vld [vmem:[#allocation2 + $0x58] sm:$0xff]  ;;  %v394_v30 = vpack.c.bf16 %v151_v26, %v150_v25  ;;  %v152_v31 = vld [vmem:[#allocation5 + $0x40] sm:$0xff]  ;;  %v153_v32 = vld [vmem:[#allocation5 + $0x48] sm:$0xff] }
  0x2e   :  { %365 = vmatpush3.bf16.msra.mxu0 %v364_v7  ;;  %v376_v33 = vpack.c.bf16 %v61_v29, %v60_v28  ;;  %v62_v34 = vld [vmem:[#allocation2 + $0x60] sm:$0xff]  ;;  %v63_v35 = vld [vmem:[#allocation2 + $0x68] sm:$0xff]  ;;  %v397_v36 = vpack.c.bf16 %v153_v32, %v152_v31  ;;  %v154_v37 = vld [vmem:[#allocation5 + $0x50] sm:$0xff] }
  0x2f   :  { %366 = vmatprep.subr.bf16.mxu0 %v492_v0  ;;  %v155_v38 = vld [vmem:[#allocation5 + $0x58] sm:$0xff]  ;;  %v379_v39 = vpack.c.bf16 %v63_v35, %v62_v34  ;;  %v64_v40 = vld [vmem:[#allocation2 + $0x70] sm:$0xff]  ;;  %v156_v43 = vld [vmem:[#allocation5 + $0x60] sm:$0xff] }
  0x30   :  { %389 = vmatpush3.bf16.msra.mxu1 %v388_v18  ;;  %v65_v41 = vld [vmem:[#allocation2 + $0x78] sm:$0xff]  ;;  %v400_v42 = vpack.c.bf16 %v155_v38, %v154_v37  ;;  %v157_v44 = vld [vmem:[#allocation5 + $0x68] sm:$0xff]  ;;  %v49_v47 = vld [vmem:[%s587_s0] sm:$0xff]  ;;  %s495_s0 = smov [#allocation7]  }
  0x31   :  { %390 = vmatprep.subr.bf16.mxu1 %v492_v0  ;;  %v382_v45 = vpack.c.bf16 %v65_v41, %v64_v40  ;;  %v403_v46 = vpack.c.bf16 %v157_v44, %v156_v43  ;;  %v158_v48 = vld [vmem:[#allocation5 + $0x70] sm:$0xff]  ;;  %v159_v49 = vld [vmem:[#allocation5 + $0x78] sm:$0xff]  ;;  %v254_v51 = vld [vmem:[%s589_s2] ss:$0 sm:$0xff]  ;;  %s244_s23 = sshll.u32 %s495_s0, 4  ;;  %s245_s23 = int_to_ptr.vmem [resolvable:$true] %s244_s23 }
  0x32   :  { %368 = vmatpush3.bf16.msra.mxu0 %v367_v14  ;;  %v406_v50 = vpack.c.bf16 %v159_v49, %v158_v48  ;;  %v255_v56 = vld [vmem:[%s591_s4] ss:$0 sm:$0xff]  ;;  %s460_s24 = scalar_lea.vmem %s245_s23, 128  ;;  %p465_p3 = scmp.lt.s32.totalorder %s245_s23, %s245_s23 }
  0x33   :  { %369 = vmatprep.subr.bf16.mxu0 %v492_v0  ;;  %p461_p2 = scmp.ne.s32.totalorder %s245_s23, %s460_s24  ;;  %p466_p4 = scmp.lt.s32.totalorder %s460_s24, %s460_s24 }
  0x34   :  { %392 = vmatpush3.bf16.msra.mxu1 %v391_v24 }
  0x35   :  { %393 = vmatprep.subr.bf16.mxu1 %v492_v0  ;;  %p467_p5 = por %p466_p4, %p465_p3 }
  0x36   :  { %371 = vmatpush3.bf16.msra.mxu0 %v370_v21 }
  0x37   :  { %372 = vmatprep.subr.bf16.mxu0 %v492_v0  ;;  %p468_p6 = pnand %p467_p5, %p461_p2 }
  0x38   :  { %395 = vmatpush3.bf16.msra.mxu1 %v394_v30 }
  0x39   :  { %396 = vmatprep.subr.bf16.mxu1 %v492_v0 }
  0x3a   :  { %374 = vmatpush3.bf16.msra.mxu0 %v373_v27 }
  0x3b   :  { %375 = vmatprep.subr.bf16.mxu0 %v492_v0 }
  0x3c   :  { %398 = vmatpush3.bf16.msra.mxu1 %v397_v36 }
  0x3d   :  { %399 = vmatprep.subr.bf16.mxu1 %v492_v0 }
  0x3e   :  { %377 = vmatpush3.bf16.msra.mxu0 %v376_v33 }
  0x3f   :  { %378 = vmatprep.subr.bf16.mxu0 %v492_v0 }
  0x40   :  { %401 = vmatpush3.bf16.msra.mxu1 %v400_v42 }
  0x41   :  { %402 = vmatprep.subr.bf16.mxu1 %v492_v0 }
  0x42   :  { %380 = vmatpush3.bf16.msra.mxu0 %v379_v39 }
  0x43   :  { %381 = vmatprep.subr.bf16.mxu0 %v492_v0 }
  0x44   :  { %404 = vmatpush3.bf16.msra.mxu1 %v403_v46 }
  0x45   :  { %405 = vmatprep.subr.bf16.mxu1 %v492_v0 }
  0x46   :  { %383 = vmatpush3.bf16.msra.mxu0 %v382_v45 }
  0x48   :  { %407 = vmatpush3.bf16.msra.mxu1 %v406_v50 }
  0x49   :  { %323 = vmatmul.mubr.f32.vlgmr.msra.gmra.mrb[0].mxu0 %v49_v47 }
 0x11c   :  { %v139_v52 = vpop.f32.mrb[0].mxu0 }
 0x11d   :  { %v140_v53 = vadd.f32 %v254_v51, %v139_v52  ;;  %v324_v54 = vpop.f32.mrb[1].mxu0 }
 0x11f   :  { %v143_v55 = vmax.f32 %v140_v53, 0.0 }
 0x121   :  { %358 = vmatmul.mubr.f32.vlgmr.msra.gmra.mrb[0].mxu1 %v143_v55 }
 0x1f4   :  { %v233_v57 = vpop.f32.mrb[0].mxu1 }
 0x1f5   :  { %v234_v58 = vadd.f32 %v255_v56, %v233_v57  ;;  %v359_v59 = vpop.f32.mrb[1].mxu1 }
 0x1f7   :  { %237 = vst [vmem:[#allocation7] sm:$0xff] %v234_v58 }
 0x1f8   :  { %471 = shalt.err (!%p468_p6)
}
 0x1f9   :  { %s472_s26 = scalar_lea.hbm %s592_s5, 128 }
 0x1fa   :  { %p473_p7 = scmp.ne.s32.totalorder %s592_s5, %s472_s26  ;;  %p476_p8 = scmp.lt.u32.totalorder %s472_s26, %s592_s5 }
 0x1fc   :  { %p478_p9 = pnand %p476_p8, %p473_p7 }
 0x1fe   :  { %481 = shalt.err (!%p478_p9)
}
 0x1ff   :  { %247 = dma.vmem_to_hbm [thread:$0]  %s245_s23, 128, %s592_s5, [#allocation4]  }
 0x200   :  { %486 = dma.done.wait [#allocation4], 128  }
 0x201   :  { %487 = vsyncadd [#allocation4], 4294967168 }
 0x202   :  { %251 = vsyncpa [#allocation3], 1 }
 0x203   :  { %252 = vsyncpa [#allocation6], 1 }
 0x204   :  { %253 = vsyncpa [#allocation4], 1 }

</bundles_post_ra>
